<compile_context>
chip_gen: v5e
topology: v5e:2x2
jax: 0.10.0
libtpu: 0.0.40
codegen_flags: <defaults>
</compile_context>

<pallas_src>
import jax
import jax.numpy as jnp
from jax.experimental import pallas as pl
from jax.experimental.pallas import tpu as pltpu


def _fusion_kernel(x_ref, w_ref, b_ref, out_ref):
    x = x_ref[...]                     # [Bt, T, 2D] f32 (fused [O_vc | O_QoS])
    T = x.shape[1]

    w = w_ref[...]                     # [8, 2D] packed weight rows
    # Per-row scalar projections: VPU broadcast-multiply + XLU lane reduce.
    s4    = jnp.sum(x * w[0], axis=-1)   # FC4 gate pre-activation     [Bt, T]
    p5_vc = jnp.sum(x * w[1], axis=-1)   # FC5 vc half                 [Bt, T]
    p5_qs = jnp.sum(x * w[2], axis=-1)   # FC5 qos half                [Bt, T]
    s2    = jnp.sum(x * w[3], axis=-1)   # FC2 gate pre-act (per row)  [Bt, T]
    p3_vc = jnp.sum(x * w[4], axis=-1)   # FC3 vc half (per row)       [Bt, T]
    p3_qs = jnp.sum(x * w[5], axis=-1)   # FC3 qos half (per row)      [Bt, T]

    b2 = b_ref[0]                      # SMEM scalars
    b3 = b_ref[1]
    b4 = b_ref[2]
    b5 = b_ref[3]

    # Continuous head (per time step), gating factored via linearity:
    # cat(a*u, (1-a)*v) @ [w_vc; w_qos] == a*(u@w_vc) + (1-a)*(v@w_qos).
    cont_alpha = jax.nn.sigmoid(s4 + b4)                                 # [Bt, T]
    cont_qoe = cont_alpha * p5_vc + (1.0 - cont_alpha) * p5_qs + b5      # [Bt, T]

    # Overall head: mean over time commutes with the linear projection.
    s2_m   = jnp.mean(s2, axis=1, keepdims=True)                         # [Bt, 1]
    p3vc_m = jnp.mean(p3_vc, axis=1, keepdims=True)                      # [Bt, 1]
    p3qs_m = jnp.mean(p3_qs, axis=1, keepdims=True)                      # [Bt, 1]
    overall_alpha = jax.nn.sigmoid(s2_m + b2)                            # [Bt, 1]
    overall_qoe = (overall_alpha * p3vc_m
                   + (1.0 - overall_alpha) * p3qs_m + b3)                # [Bt, 1]

    # Lane-dense merged output: cols 0..T-1 continuous, col T overall.
    out_ref[:, 0:T] = cont_qoe
    out_ref[:, T:T + 1] = overall_qoe


def _pick_block_b(B, T, D2, block_b):
    """Choose the per-step sequence count (multiple of 8 unless it spans B)."""
    if block_b is None:
        bytes_per_seq = T * D2 * 4
        block_b = max(1, (2 << 20) // max(bytes_per_seq, 1))   # ~2 MiB / block
    block_b = min(block_b, B)
    if block_b < B:
        block_b = max(8, (block_b // 8) * 8)   # output sublane-tile alignment
    return max(1, block_b)


def feature_fusion_batched(x_fused, w_packed, b_packed, *, block_b=None):
    """x_fused: [B, T, 2D] f32 (concat of O_vc, O_QoS on the feature axis).

    Returns (overall_QoE [B], continuous_QoE [B, T]).
    """
    B, T, D2 = x_fused.shape
    block_b = _pick_block_b(B, T, D2, block_b)
    num_blocks = pl.cdiv(B, block_b)
    Bp = num_blocks * block_b
    if Bp != B:
        pad = jnp.zeros((Bp - B, T, D2), x_fused.dtype)
        x_in = jnp.concatenate([x_fused, pad], axis=0)
    else:
        x_in = x_fused

    out = pl.pallas_call(
        _fusion_kernel,
        out_shape=jax.ShapeDtypeStruct((Bp, T + 1), jnp.float32),
        grid=(num_blocks,),
        in_specs=[
            pl.BlockSpec((block_b, T, D2), lambda i: (i, 0, 0)),   # fused input
            pl.BlockSpec((8, D2), lambda i: (0, 0)),               # packed weights
            pl.BlockSpec(memory_space=pltpu.MemorySpace.SMEM),     # packed biases
        ],
        out_specs=pl.BlockSpec((block_b, T + 1), lambda i: (i, 0)),
        compiler_params=pltpu.CompilerParams(
            dimension_semantics=("parallel",)),
    )(x_in, w_packed, b_packed)

    out = out[:B]
    return out[:, T], out[:, :T]


def pack_params(params, D):
    """Pack FC2..FC5 Linear(2D,1) weights into [8, 2D] rows, biases into f32[4].

    Row layout: 0=FC4 full, 1=FC5 vc-half, 2=FC5 qos-half, 3=FC2 full,
    4=FC3 vc-half, 5=FC3 qos-half, 6..7=zero padding (sublane tile).
    """
    (w2, b2), (w3, b3), (w4, b4), (w5, b5) = params
    z = jnp.zeros((D,), jnp.float32)
    w2f, w3f, w4f, w5f = w2[:, 0], w3[:, 0], w4[:, 0], w5[:, 0]
    rows = [
        w4f,
        jnp.concatenate([w5f[:D], z]),
        jnp.concatenate([z, w5f[D:]]),
        w2f,
        jnp.concatenate([w3f[:D], z]),
        jnp.concatenate([z, w3f[D:]]),
        jnp.zeros((2 * D,), jnp.float32),
        jnp.zeros((2 * D,), jnp.float32),
    ]
    w_packed = jnp.stack(rows, axis=0).astype(jnp.float32)           # [8, 2D]
    b_packed = jnp.stack([b2.reshape(()), b3.reshape(()),
                          b4.reshape(()), b5.reshape(())]).astype(jnp.float32)
    return w_packed, b_packed


def feature_fusion(o_vc, o_qos, params):
    """Single-sequence API matching the PyTorch forward: returns ([1], [T, 1])."""
    D = o_vc.shape[-1]
    w_packed, b_packed = pack_params(params, D)
    fused = jnp.concatenate([o_vc, o_qos], axis=-1)[None]            # [1, T, 2D]
    overall, cont = feature_fusion_batched(fused, w_packed, b_packed)
    return overall.reshape((1,)), cont[0][:, None]


def init_params(key, D):
    """Deterministic Linear(2D, 1) params for FC2..FC5; weights [2D,1], biases [1,1]."""
    ks = jax.random.split(key, 4)
    scale = 1.0 / jnp.sqrt(2.0 * D)
    params = []
    for i, k in enumerate(ks):
        w = jax.random.normal(k, (2 * D, 1), dtype=jnp.float32) * scale
        b = jnp.full((1, 1), 0.01 * (i + 1), dtype=jnp.float32)
        params.append((w, b))
    return tuple(params)


def _reference(o_vc, o_qos, params):
    """Pure-JAX reference mirroring the PyTorch module (single sequence [T, D])."""
    (w2, b2), (w3, b3), (w4, b4), (w5, b5) = params
    x_vc = jnp.mean(o_vc, axis=0)
    x_qos = jnp.mean(o_qos, axis=0)
    overall_alpha = jax.nn.sigmoid(jnp.concatenate([x_vc, x_qos]) @ w2[:, 0] + b2[0, 0])
    cont_alpha = jax.nn.sigmoid(jnp.concatenate([o_vc, o_qos], axis=1) @ w4 + b4[0])
    overall_qoe = (jnp.concatenate([overall_alpha * x_vc,
                                    (1 - overall_alpha) * x_qos]) @ w3[:, 0] + b3[0, 0])
    cont_qoe = (jnp.concatenate([cont_alpha * o_vc,
                                 (1 - cont_alpha) * o_qos], axis=1) @ w5 + b5[0])
    return overall_qoe.reshape((1,)), cont_qoe


if __name__ == "__main__":
    key = jax.random.PRNGKey(0)
    k_vc, k_qos, k_p = jax.random.split(key, 3)

    T, D = 8, 32
    params = init_params(k_p, D)
    w_packed, b_packed = pack_params(params, D)

    # Config 1: small batch, single grid step.
    B1 = 8
    o_vc = jax.random.normal(k_vc, (B1, T, D), dtype=jnp.float32)
    o_qos = jax.random.normal(k_qos, (B1, T, D), dtype=jnp.float32)
    x_fused = jnp.concatenate([o_vc, o_qos], axis=-1)
    overall_b, cont_b = feature_fusion_batched(x_fused, w_packed, b_packed)
    jax.block_until_ready(overall_b)
    jax.block_until_ready(cont_b)
    for b in range(B1):
        ref_overall, ref_cont = _reference(o_vc[b], o_qos[b], params)
        assert jnp.allclose(overall_b[b:b + 1], ref_overall, atol=1e-5, rtol=1e-5)
        assert jnp.allclose(cont_b[b], ref_cont[:, 0], atol=1e-5, rtol=1e-5)

    # Config 2: non-divisible batch, multi-step grid (padding path + both TCs).
    B2 = 37
    o_vc2 = jax.random.normal(jax.random.PRNGKey(1), (B2, T, D), dtype=jnp.float32)
    o_qos2 = jax.random.normal(jax.random.PRNGKey(2), (B2, T, D), dtype=jnp.float32)
    overall2, cont2 = feature_fusion_batched(
        jnp.concatenate([o_vc2, o_qos2], axis=-1), w_packed, b_packed, block_b=16)
    jax.block_until_ready(cont2)
    for b in range(B2):
        ref_overall, ref_cont = _reference(o_vc2[b], o_qos2[b], params)
        assert jnp.allclose(overall2[b:b + 1], ref_overall, atol=1e-5, rtol=1e-5)
        assert jnp.allclose(cont2[b], ref_cont[:, 0], atol=1e-5, rtol=1e-5)

    # Single-sequence API matching the original module forward.
    overall1, cont1 = feature_fusion(o_vc[0], o_qos[0], params)
    jax.block_until_ready(cont1)
    ref_overall, ref_cont = _reference(o_vc[0], o_qos[0], params)
    assert jnp.allclose(overall1, ref_overall, atol=1e-5, rtol=1e-5)
    assert jnp.allclose(cont1, ref_cont, atol=1e-5, rtol=1e-5)

    print("KERNEL_OK")
</pallas_src>

<mosaic_0001>
module attributes {stable_mosaic.version = 11 : i64} {
  func.func @_fusion_kernel(%arg0: i32, %arg1: memref<8x8x64xf32, #tpu.memory_space<vmem>>, %arg2: memref<8x64xf32, #tpu.memory_space<vmem>>, %arg3: memref<4xf32, #tpu.memory_space<smem>>, %arg4: memref<8x9xf32, #tpu.memory_space<vmem>>) attributes {dimension_semantics = [#tpu.dimension_semantics<parallel>], iteration_bounds = array<i64: 1>, scalar_prefetch = 0 : i64, scratch_operands = 0 : i64, tpu.core_type = #tpu.core_type<tc>, window_params = [{transform_indices = @transform_0, window_bounds = array<i64: 8, 8, 64>}, {pipeline_mode = #tpu.pipeline_mode<synchronous>, transform_indices = @transform_1, window_bounds = array<i64: 8, 64>}, {transform_indices = @transform_2, window_bounds = array<i64: 4>}, {transform_indices = @transform_3, window_bounds = array<i64: 8, 9>}]} {
    %c0 = arith.constant 0 : index
    %c0_0 = arith.constant 0 : index
    %c0_1 = arith.constant 0 : index
    %0 = vector.load %arg1[%c0, %c0_0, %c0_1] : memref<8x8x64xf32, #tpu.memory_space<vmem>>, vector<8x8x64xf32>
    %c0_2 = arith.constant 0 : index
    %c0_3 = arith.constant 0 : index
    %1 = vector.load %arg2[%c0_2, %c0_3] : memref<8x64xf32, #tpu.memory_space<vmem>>, vector<8x64xf32>
    %2 = vector.extract_strided_slice %1 {offsets = [0, 0], sizes = [1, 64], strides = [1, 1]} : vector<8x64xf32> to vector<1x64xf32>
    %3 = vector.shape_cast %2 : vector<1x64xf32> to vector<64xf32>
    %4 = vector.shape_cast %3 : vector<64xf32> to vector<1x1x64xf32>
    %5 = vector.broadcast %4 : vector<1x1x64xf32> to vector<8x8x64xf32>
    %6 = arith.mulf %0, %5 : vector<8x8x64xf32>
    %cst = arith.constant dense<0.000000e+00> : vector<8x8xf32>
    %7 = vector.multi_reduction <add>, %6, %cst [2] : vector<8x8x64xf32> to vector<8x8xf32>
    %8 = vector.extract_strided_slice %1 {offsets = [1, 0], sizes = [1, 64], strides = [1, 1]} : vector<8x64xf32> to vector<1x64xf32>
    %9 = vector.shape_cast %8 : vector<1x64xf32> to vector<64xf32>
    %10 = vector.shape_cast %9 : vector<64xf32> to vector<1x1x64xf32>
    %11 = vector.broadcast %10 : vector<1x1x64xf32> to vector<8x8x64xf32>
    %12 = arith.mulf %0, %11 : vector<8x8x64xf32>
    %cst_4 = arith.constant dense<0.000000e+00> : vector<8x8xf32>
    %13 = vector.multi_reduction <add>, %12, %cst_4 [2] : vector<8x8x64xf32> to vector<8x8xf32>
    %14 = vector.extract_strided_slice %1 {offsets = [2, 0], sizes = [1, 64], strides = [1, 1]} : vector<8x64xf32> to vector<1x64xf32>
    %15 = vector.shape_cast %14 : vector<1x64xf32> to vector<64xf32>
    %16 = vector.shape_cast %15 : vector<64xf32> to vector<1x1x64xf32>
    %17 = vector.broadcast %16 : vector<1x1x64xf32> to vector<8x8x64xf32>
    %18 = arith.mulf %0, %17 : vector<8x8x64xf32>
    %cst_5 = arith.constant dense<0.000000e+00> : vector<8x8xf32>
    %19 = vector.multi_reduction <add>, %18, %cst_5 [2] : vector<8x8x64xf32> to vector<8x8xf32>
    %20 = vector.extract_strided_slice %1 {offsets = [3, 0], sizes = [1, 64], strides = [1, 1]} : vector<8x64xf32> to vector<1x64xf32>
    %21 = vector.shape_cast %20 : vector<1x64xf32> to vector<64xf32>
    %22 = vector.shape_cast %21 : vector<64xf32> to vector<1x1x64xf32>
    %23 = vector.broadcast %22 : vector<1x1x64xf32> to vector<8x8x64xf32>
    %24 = arith.mulf %0, %23 : vector<8x8x64xf32>
    %cst_6 = arith.constant dense<0.000000e+00> : vector<8x8xf32>
    %25 = vector.multi_reduction <add>, %24, %cst_6 [2] : vector<8x8x64xf32> to vector<8x8xf32>
    %26 = vector.extract_strided_slice %1 {offsets = [4, 0], sizes = [1, 64], strides = [1, 1]} : vector<8x64xf32> to vector<1x64xf32>
    %27 = vector.shape_cast %26 : vector<1x64xf32> to vector<64xf32>
    %28 = vector.shape_cast %27 : vector<64xf32> to vector<1x1x64xf32>
    %29 = vector.broadcast %28 : vector<1x1x64xf32> to vector<8x8x64xf32>
    %30 = arith.mulf %0, %29 : vector<8x8x64xf32>
    %cst_7 = arith.constant dense<0.000000e+00> : vector<8x8xf32>
    %31 = vector.multi_reduction <add>, %30, %cst_7 [2] : vector<8x8x64xf32> to vector<8x8xf32>
    %32 = vector.extract_strided_slice %1 {offsets = [5, 0], sizes = [1, 64], strides = [1, 1]} : vector<8x64xf32> to vector<1x64xf32>
    %33 = vector.shape_cast %32 : vector<1x64xf32> to vector<64xf32>
    %34 = vector.shape_cast %33 : vector<64xf32> to vector<1x1x64xf32>
    %35 = vector.broadcast %34 : vector<1x1x64xf32> to vector<8x8x64xf32>
    %36 = arith.mulf %0, %35 : vector<8x8x64xf32>
    %cst_8 = arith.constant dense<0.000000e+00> : vector<8x8xf32>
    %37 = vector.multi_reduction <add>, %36, %cst_8 [2] : vector<8x8x64xf32> to vector<8x8xf32>
    %c0_9 = arith.constant 0 : index
    %38 = memref.load %arg3[%c0_9] : memref<4xf32, #tpu.memory_space<smem>>
    %c1 = arith.constant 1 : index
    %39 = memref.load %arg3[%c1] : memref<4xf32, #tpu.memory_space<smem>>
    %c2 = arith.constant 2 : index
    %40 = memref.load %arg3[%c2] : memref<4xf32, #tpu.memory_space<smem>>
    %c3 = arith.constant 3 : index
    %41 = memref.load %arg3[%c3] : memref<4xf32, #tpu.memory_space<smem>>
    %42 = vector.broadcast %40 : f32 to vector<8x8xf32>
    %43 = arith.addf %7, %42 : vector<8x8xf32>
    %44 = arith.negf %43 : vector<8x8xf32>
    %45 = math.exp %44 : vector<8x8xf32>
    %cst_10 = arith.constant 1.000000e+00 : f32
    %46 = vector.broadcast %cst_10 : f32 to vector<8x8xf32>
    %47 = arith.addf %46, %45 : vector<8x8xf32>
    %48 = arith.divf %46, %47 : vector<8x8xf32>
    %49 = arith.mulf %48, %13 : vector<8x8xf32>
    %cst_11 = arith.constant 1.000000e+00 : f32
    %50 = vector.broadcast %cst_11 : f32 to vector<8x8xf32>
    %51 = arith.subf %50, %48 : vector<8x8xf32>
    %52 = arith.mulf %51, %19 : vector<8x8xf32>
    %53 = arith.addf %49, %52 : vector<8x8xf32>
    %54 = vector.broadcast %41 : f32 to vector<8x8xf32>
    %55 = arith.addf %53, %54 : vector<8x8xf32>
    %cst_12 = arith.constant dense<0.000000e+00> : vector<8xf32>
    %56 = vector.multi_reduction <add>, %25, %cst_12 [1] : vector<8x8xf32> to vector<8xf32>
    %57 = vector.shape_cast %56 : vector<8xf32> to vector<8x1xf32>
    %cst_13 = arith.constant 8.000000e+00 : f32
    %58 = vector.broadcast %cst_13 : f32 to vector<8x1xf32>
    %59 = arith.divf %57, %58 : vector<8x1xf32>
    %cst_14 = arith.constant dense<0.000000e+00> : vector<8xf32>
    %60 = vector.multi_reduction <add>, %31, %cst_14 [1] : vector<8x8xf32> to vector<8xf32>
    %61 = vector.shape_cast %60 : vector<8xf32> to vector<8x1xf32>
    %cst_15 = arith.constant 8.000000e+00 : f32
    %62 = vector.broadcast %cst_15 : f32 to vector<8x1xf32>
    %63 = arith.divf %61, %62 : vector<8x1xf32>
    %cst_16 = arith.constant dense<0.000000e+00> : vector<8xf32>
    %64 = vector.multi_reduction <add>, %37, %cst_16 [1] : vector<8x8xf32> to vector<8xf32>
    %65 = vector.shape_cast %64 : vector<8xf32> to vector<8x1xf32>
    %cst_17 = arith.constant 8.000000e+00 : f32
    %66 = vector.broadcast %cst_17 : f32 to vector<8x1xf32>
    %67 = arith.divf %65, %66 : vector<8x1xf32>
    %68 = vector.broadcast %38 : f32 to vector<8x1xf32>
    %69 = arith.addf %59, %68 : vector<8x1xf32>
    %70 = arith.negf %69 : vector<8x1xf32>
    %71 = math.exp %70 : vector<8x1xf32>
    %cst_18 = arith.constant 1.000000e+00 : f32
    %72 = vector.broadcast %cst_18 : f32 to vector<8x1xf32>
    %73 = arith.addf %72, %71 : vector<8x1xf32>
    %74 = arith.divf %72, %73 : vector<8x1xf32>
    %75 = arith.mulf %74, %63 : vector<8x1xf32>
    %cst_19 = arith.constant 1.000000e+00 : f32
    %76 = vector.broadcast %cst_19 : f32 to vector<8x1xf32>
    %77 = arith.subf %76, %74 : vector<8x1xf32>
    %78 = arith.mulf %77, %67 : vector<8x1xf32>
    %79 = arith.addf %75, %78 : vector<8x1xf32>
    %80 = vector.broadcast %39 : f32 to vector<8x1xf32>
    %81 = arith.addf %79, %80 : vector<8x1xf32>
    %c0_20 = arith.constant 0 : index
    %c0_21 = arith.constant 0 : index
    %82 = vector.load %arg4[%c0_20, %c0_21] : memref<8x9xf32, #tpu.memory_space<vmem>>, vector<8x8xf32>
    tpu.vector_store %arg4[%c0_20, %c0_21], %55 {strides = array<i32>} : memref<8x9xf32, #tpu.memory_space<vmem>>, vector<8x8xf32>,
    %c0_22 = arith.constant 0 : index
    %c8 = arith.constant 8 : index
    %83 = vector.load %arg4[%c0_22, %c8] : memref<8x9xf32, #tpu.memory_space<vmem>>, vector<8x1xf32>
    tpu.vector_store %arg4[%c0_22, %c8], %81 {strides = array<i32>} : memref<8x9xf32, #tpu.memory_space<vmem>>, vector<8x1xf32>,
    return
  }
  func.func @transform_0(%arg0: i32) -> (i32, i32, i32) {
    %c0_i32 = arith.constant 0 : i32
    %c0_i32_0 = arith.constant 0 : i32
    %c0_i32_1 = arith.constant 0 : i32
    return %arg0, %c0_i32, %c0_i32_0 : i32, i32, i32
  }
  func.func @transform_1(%arg0: i32) -> (i32, i32) {
    %c0_i32 = arith.constant 0 : i32
    %c0_i32_0 = arith.constant 0 : i32
    %c0_i32_1 = arith.constant 0 : i32
    return %c0_i32, %c0_i32_0 : i32, i32
  }
  func.func @transform_2(%arg0: i32) -> i32 {
    %c0_i32 = arith.constant 0 : i32
    %c0_i32_0 = arith.constant 0 : i32
    return %c0_i32 : i32
  }
  func.func @transform_3(%arg0: i32) -> (i32, i32) {
    %c0_i32 = arith.constant 0 : i32
    %c0_i32_0 = arith.constant 0 : i32
    return %arg0, %c0_i32 : i32, i32
  }
}

</mosaic_0001>

<bundles_post_ra>
// kernel: tpu_custom_call.1
= control target key start
LH: loop header
LB: loop body
LE: loop exit
PB: predicated region body
PF: predicated region fallthrough
CT: control target
= control target key end

     0   :  { %8 = vsyncpa [#allocation3], 0  ;;  %s1184_s0 = inlined_call_operand.hbm [shape: f32[8,8,64], index: 0, kind: input, shape index: {}]   ;;  %s1185_s1 = inlined_call_operand.hbm [shape: f32[8,64], index: 1, kind: input, shape index: {}]   ;;  %s1186_s2 = inlined_call_operand.vmem [shape: f32[4], index: 2, kind: input, shape index: {}]   ;;  %s1187_s3 = inlined_call_operand.hbm [shape: f32[8,9], index: 3, kind: output, shape index: {}]  }
   0x1   :  { %9 = vsyncpa [#allocation7], 0 }
   0x2   :  { %10 = vsyncpa [#allocation5], 0 }
   0x3   :  { %11 = vsyncpa [#allocation4], 0  ;;  %s16_s14 = sshll.u32 %s1184_s0, 4  ;;  %s795_s15 = smov [#allocation2]   ;;  %s17_s14 = int_to_ptr.hbm [resolvable:$true] %s16_s14 }
   0x4   :  { %s18_s16 = sshll.u32 %s795_s15, 4  ;;  %s30_s19 = sshll.u32 %s1185_s1, 4  ;;  %s19_s16 = int_to_ptr.vmem [resolvable:$true] %s18_s16  ;;  %s31_s19 = int_to_ptr.hbm [resolvable:$true] %s30_s19 }
   0x5   :  { %s796_s20 = smov 128   ;;  %s797_s21 = smov 8  }
   0x6   :  { %24 = dma.hbm_to_vmem [thread:$0]  %s17_s14, 1024, %s19_s16, [#allocation3], %s796_s20, %s796_s20, %s797_s21  }
   0x7   :  { %s798_s22 = smov [#allocation6]   ;;  %s41_s26 = sshll.u32 %s1186_s2, 4  ;;  %s42_s26 = int_to_ptr.vmem [resolvable:$true] %s41_s26 }
   0x8   :  { %s32_s23 = sshll.u32 %s798_s22, 4  ;;  %s799_s0 = smov [#allocation8]   ;;  %s33_s23 = int_to_ptr.vmem [resolvable:$true] %s32_s23 }
   0x9   :  { %35 = dma.hbm_to_vmem [thread:$0]  %s31_s19, 128, %s33_s23, [#allocation7]  }
   0xa   :  { %44 = dma.vmem_to_smem %s42_s26, 16, %s799_s0, [#allocation5]  }
   0xb   :  { %787 = dma.done.wait [#allocation3], 1024  }
   0xc   :  { %788 = vsyncadd [#allocation3], 4294966272 }
   0xd   :  { %789 = dma.done.wait [#allocation7], 128  }
   0xe   :  { %790 = vsyncadd [#allocation7], 4294967168 }
   0xf   :  { %791 = dma.done.wait [#allocation5], 16  }
  0x10   :  { %792 = vsyncadd [#allocation5], 4294967280 }
  0x11   :  { %57 = sfence }
  0x12   :  { %v831_v0 = vld [vmem:[#allocation2 + $0x20] sm:$0xff]  ;;  %v835_v2 = vld [vmem:[#allocation2 + $0x10] sm:$0xff]  ;;  %vm76_vm0 = vcmask 523264   ;;  %v843_v8 = vld [vmem:[#allocation2 + $0x28] sm:$0xff]  ;;  %s647_s1 = sld [smem:[#allocation8 + $0x2]]  ;;  %vm490_vm1 = vcmask 1041409  }
  0x13   :  { %v833_v1 = vld [vmem:[#allocation6] sm:$0xff]  ;;  %v845_v9 = vld [vmem:[#allocation2 + $0x18] sm:$0xff]  ;;  %v850_v13 = vld [vmem:[#allocation2 + $0x8] sm:$0xff]  ;;  %vm492_vm2 = vcmask 1042434   ;;  %vm494_vm3 = vcmask 1043459   ;;  %vm496_vm5 = vcmask 1044484  }
  0x14   :  { %v67_v3 = vperm.slane %v833_v1, 0  ;;  %v838_v4 = vld [vmem:[#allocation2] sm:$0xff]  ;;  %v167_v19 = vperm.slane %v833_v1, 3  ;;  %v859_v21 = vld [vmem:[#allocation2 + $0x38] sm:$0xff]  ;;  %v861_v22 = vld [vmem:[#allocation2 + $0x30] sm:$0xff]  ;;  %v881_v40 = vperm.slane %v833_v1, 1 }
  0x15   :  { %v233_v47 = vperm.slane %v833_v1, 5  ;;  %v200_v48 = vperm.slane %v833_v1, 4  ;;  %vm498_vm8 = vcmask 1045509   ;;  %vm500_vm11 = vcmask 1046534   ;;  %s648_s2 = sld [smem:[#allocation8 + $0x3]]  ;;  %s801_s29 = smov [#allocation9]  }
  0x16   :  { %v72_v5 = vmul.f32 %v67_v3, %v831_v0  ;;  %v70_v6 = vmul.f32 %v67_v3, %v835_v2  ;;  %v68_v7 = vmul.f32 %v67_v3, %v838_v4  ;;  %v73_v14 = vmul.f32 %v67_v3, %v843_v8  ;;  %s1109_s27 = sld [smem:[#allocation8]]  ;;  %s632_s30 = sshll.u32 %s801_s29, 4  ;;  %s633_s30 = int_to_ptr.vmem [resolvable:$true] %s632_s30 }
  0x17   :  { %v71_v15 = vmul.f32 %v67_v3, %v845_v9  ;;  %v69_v16 = vmul.f32 %v67_v3, %v850_v13  ;;  %v75_v23 = vmul.f32 %v67_v3, %v859_v21  ;;  %v168_v24 = vmul.f32 %v167_v19, %v838_v4  ;;  %s646_s28 = sld [smem:[#allocation8 + $0x1]]  ;;  %s634_s6 = sshll.u32 %s1187_s3, 4  ;;  %s635_s6 = int_to_ptr.hbm [resolvable:$true] %s634_s6 }
  0x18   :  { %v89_v10 = vsel %vm76_vm0, %v72_v5, 0.0  ;;  %v83_v11 = vsel %vm76_vm0, %v70_v6, 0.0  ;;  %v77_v12 = vsel %vm76_vm0, %v68_v7, 0.0  ;;  %v92_v17 = vsel %vm76_vm0, %v73_v14, 0.0 }
  0x19   :  { %90 = vadd.xlane.f32.xlu2 %v89_v10  ;;  %84 = vadd.xlane.f32.xlu1 %v83_v11  ;;  %v86_v18 = vsel %vm76_vm0, %v71_v15, 0.0  ;;  %v80_v20 = vsel %vm76_vm0, %v69_v16, 0.0  ;;  %v74_v25 = vmul.f32 %v67_v3, %v861_v22  ;;  %v98_v26 = vsel %vm76_vm0, %v75_v23, 0.0 }
  0x1a   :  { %78 = vadd.xlane.f32.xlu0 %v77_v12  ;;  %v176_v27 = vsel %vm76_vm0, %v168_v24, 0.0  ;;  %v170_v29 = vmul.f32 %v167_v19, %v835_v2  ;;  %v171_v30 = vmul.f32 %v167_v19, %v845_v9  ;;  %v169_v31 = vmul.f32 %v167_v19, %v850_v13 }
  0x1b   :  { %v95_v28 = vsel %vm76_vm0, %v74_v25, 0.0  ;;  %v173_v35 = vmul.f32 %v167_v19, %v843_v8  ;;  %v174_v36 = vmul.f32 %v167_v19, %v861_v22  ;;  %v172_v37 = vmul.f32 %v167_v19, %v831_v0 }
  0x1c   :  { %v182_v32 = vsel %vm76_vm0, %v170_v29, 0.0  ;;  %v185_v33 = vsel %vm76_vm0, %v171_v30, 0.0  ;;  %v179_v34 = vsel %vm76_vm0, %v169_v31, 0.0  ;;  %v103_v42 = vmul.f32 %v881_v40, %v850_v13 }
  0x1d   :  { %v191_v38 = vsel %vm76_vm0, %v173_v35, 0.0  ;;  %v194_v39 = vsel %vm76_vm0, %v174_v36, 0.0  ;;  %v188_v41 = vsel %vm76_vm0, %v172_v37, 0.0  ;;  %v102_v43 = vmul.f32 %v881_v40, %v838_v4 }
  0x1e   :  { %v175_v44 = vmul.f32 %v167_v19, %v859_v21  ;;  %v113_v45 = vsel %vm76_vm0, %v103_v42, 0.0  ;;  %v234_v50 = vmul.f32 %v233_v47, %v838_v4  ;;  %v202_v51 = vmul.f32 %v200_v48, %v850_v13 }
  0x1f   :  { %v110_v46 = vsel %vm76_vm0, %v102_v43, 0.0  ;;  %v201_v52 = vmul.f32 %v200_v48, %v838_v4  ;;  %v236_v56 = vmul.f32 %v233_v47, %v835_v2  ;;  %v203_v57 = vmul.f32 %v200_v48, %v835_v2 }
  0x20   :  { %v197_v49 = vsel %vm76_vm0, %v175_v44, 0.0  ;;  %v242_v53 = vsel %vm76_vm0, %v234_v50, 0.0  ;;  %v212_v54 = vsel %vm76_vm0, %v202_v51, 0.0  ;;  %v235_v58 = vmul.f32 %v233_v47, %v850_v13 }
  0x21   :  { %93 = vadd.xlane.f32.xlu2 %v92_v17  ;;  %87 = vadd.xlane.f32.xlu1 %v86_v18  ;;  %v209_v55 = vsel %vm76_vm0, %v201_v52, 0.0  ;;  %v248_v59 = vsel %vm76_vm0, %v236_v56, 0.0  ;;  %v215_v60 = vsel %vm76_vm0, %v203_v57, 0.0  ;;  %v205_v62 = vmul.f32 %v200_v48, %v831_v0 }
  0x22   :  { %81 = vadd.xlane.f32.xlu0 %v80_v20  ;;  %v245_v61 = vsel %vm76_vm0, %v235_v58, 0.0  ;;  %v237_v63 = vmul.f32 %v233_v47, %v845_v9  ;;  %v204_v3 = vmul.f32 %v200_v48, %v845_v9  ;;  %v239_v10 = vmul.f32 %v233_v47, %v843_v8 }
  0x23   :  { %v221_v5 = vsel %vm76_vm0, %v205_v62, 0.0  ;;  %v206_v11 = vmul.f32 %v200_v48, %v843_v8  ;;  %v238_v12 = vmul.f32 %v233_v47, %v831_v0  ;;  %v208_v17 = vmul.f32 %v200_v48, %v859_v21 }
  0x24   :  { %v251_v6 = vsel %vm76_vm0, %v237_v63, 0.0  ;;  %v218_v7 = vsel %vm76_vm0, %v204_v3, 0.0  ;;  %v257_v14 = vsel %vm76_vm0, %v239_v10, 0.0  ;;  %v240_v18 = vmul.f32 %v233_v47, %v861_v22 }
  0x25   :  { %v224_v15 = vsel %vm76_vm0, %v206_v11, 0.0  ;;  %v254_v16 = vsel %vm76_vm0, %v238_v12, 0.0  ;;  %v207_v19 = vmul.f32 %v200_v48, %v861_v22  ;;  %v230_v20 = vsel %vm76_vm0, %v208_v17, 0.0 }
  0x26   :  { %v260_v23 = vsel %vm76_vm0, %v240_v18, 0.0  ;;  %v924_v24 = vperm.slane %v833_v1, 2  ;;  %v105_v35 = vmul.f32 %v881_v40, %v845_v9  ;;  %v955_v42 = vstv %s647_s1 }
  0x27   :  { %v227_v25 = vsel %vm76_vm0, %v207_v19, 0.0  ;;  %v108_v43 = vmul.f32 %v881_v40, %v861_v22  ;;  %vm502_vm14 = vcmask 1047559  }
  0x28   :  { %v137_v31 = vmul.f32 %v924_v24, %v835_v2  ;;  %v119_v37 = vsel %vm76_vm0, %v105_v35, 0.0  ;;  %v142_v50 = vmul.f32 %v924_v24, %v859_v21 }
  0x29   :  { %99 = vadd.xlane.f32.xlu1 %v98_v26  ;;  %177 = vadd.xlane.f32.xlu2 %v176_v27  ;;  %v135_v26 = vmul.f32 %v924_v24, %v838_v4  ;;  %v104_v27 = vmul.f32 %v881_v40, %v835_v2  ;;  %v136_v4 = vmul.f32 %v924_v24, %v850_v13  ;;  %v128_v48 = vsel %vm76_vm0, %v108_v43, 0.0 }
  0x2a   :  { %96 = vadd.xlane.f32.xlu0 %v95_v28  ;;  %v241_v28 = vmul.f32 %v233_v47, %v859_v21  ;;  %v140_v2 = vmul.f32 %v924_v24, %v843_v8  ;;  %v139_v13 = vmul.f32 %v924_v24, %v831_v0 }
  0x2b   :  { %v143_v29 = vsel %vm76_vm0, %v135_v26, 0.0  ;;  %v116_v30 = vsel %vm76_vm0, %v104_v27, 0.0 }
  0x2c   :  { %v263_v1 = vsel %vm76_vm0, %v241_v28, 0.0 }
  0x31   :  { %183 = vadd.xlane.f32.xlu1 %v182_v32  ;;  %186 = vadd.xlane.f32.xlu2 %v185_v33  ;;  %v149_v32 = vsel %vm76_vm0, %v137_v31, 0.0  ;;  %v146_v33 = vsel %vm76_vm0, %v136_v4, 0.0 }
  0x32   :  { %180 = vadd.xlane.f32.xlu0 %v179_v34  ;;  %v106_v34 = vmul.f32 %v881_v40, %v831_v0 }
  0x34   :  { %v122_v36 = vsel %vm76_vm0, %v106_v34, 0.0 }
  0x39   :  { %192 = vadd.xlane.f32.xlu1 %v191_v38  ;;  %195 = vadd.xlane.f32.xlu2 %v194_v39  ;;  %v158_v38 = vsel %vm76_vm0, %v140_v2, 0.0  ;;  %v155_v39 = vsel %vm76_vm0, %v139_v13, 0.0 }
  0x3a   :  { %189 = vadd.xlane.f32.xlu0 %v188_v41  ;;  %v109_v41 = vmul.f32 %v881_v40, %v859_v21  ;;  %v480_v21 = vlaneseq }
  0x3c   :  { %v131_v47 = vsel %vm76_vm0, %v109_v41, 0.0  ;;  %v978_v63 = vand.u32 127, %v480_v21 }
  0x41   :  { %114 = vadd.xlane.f32.xlu2 %v113_v45  ;;  %111 = vadd.xlane.f32.xlu1 %v110_v46 }
  0x42   :  { %198 = vadd.xlane.f32.xlu0 %v197_v49 }
  0x49   :  { %243 = vadd.xlane.f32.xlu2 %v242_v53  ;;  %213 = vadd.xlane.f32.xlu1 %v212_v54 }
  0x4a   :  { %210 = vadd.xlane.f32.xlu0 %v209_v55  ;;  %v164_v55 = vsel %vm76_vm0, %v142_v50, 0.0 }
  0x51   :  { %249 = vadd.xlane.f32.xlu2 %v248_v59  ;;  %216 = vadd.xlane.f32.xlu1 %v215_v60 }
  0x52   :  { %246 = vadd.xlane.f32.xlu0 %v245_v61 }
  0x59   :  { %222 = vadd.xlane.f32.xlu2 %v221_v5  ;;  %252 = vadd.xlane.f32.xlu1 %v251_v6 }
  0x5a   :  { %219 = vadd.xlane.f32.xlu0 %v218_v7 }
  0x61   :  { %258 = vadd.xlane.f32.xlu2 %v257_v14  ;;  %225 = vadd.xlane.f32.xlu1 %v224_v15 }
  0x62   :  { %255 = vadd.xlane.f32.xlu0 %v254_v16 }
  0x69   :  { %231 = vadd.xlane.f32.xlu2 %v230_v20  ;;  %261 = vadd.xlane.f32.xlu1 %v260_v23 }
  0x6a   :  { %228 = vadd.xlane.f32.xlu0 %v227_v25 }
  0x71   :  { %144 = vadd.xlane.f32.xlu2 %v143_v29  ;;  %117 = vadd.xlane.f32.xlu1 %v116_v30 }
  0x72   :  { %264 = vadd.xlane.f32.xlu0 %v263_v1 }
  0x79   :  { %150 = vadd.xlane.f32.xlu2 %v149_v32 }
  0x7a   :  { %147 = vadd.xlane.f32.xlu0 %v146_v33 }
  0x81   :  { %123 = vadd.xlane.f32.xlu2 %v122_v36 }
  0x82   :  { %120 = vadd.xlane.f32.xlu0 %v119_v37 }
  0x89   :  { %159 = vadd.xlane.f32.xlu2 %v158_v38 }
  0x8a   :  { %156 = vadd.xlane.f32.xlu0 %v155_v39 }
  0x8c   :  { %v959_v44 = vpop.xlane.xlu2 %90  ;;  %v961_v45 = vpop.xlane.xlu1 %84 }
  0x8d   :  { %v79_v0 = vpop.xlane.xlu0 %78 }
  0x8e   :  { %v271_v46 = vadd.f32 %v955_v42, %v79_v0 }
  0x90   :  { %v649_v49 = vmul.f32 -1.442695, %v271_v46 }
  0x91   :  { %132 = vadd.xlane.f32.xlu2 %v131_v47 }
  0x92   :  { %129 = vadd.xlane.f32.xlu0 %v128_v48  ;;  %665 = vpow2.f32 %v649_v49 }
  0x94   :  { %v968_v51 = vpop.xlane.xlu2 %93  ;;  %v970_v52 = vpop.xlane.xlu1 %87 }
  0x95   :  { %v82_v53 = vpop.xlane.xlu0 %81 }
  0x96   :  { %v272_v54 = vadd.f32 %v955_v42, %v82_v53 }
  0x98   :  { %v666_v56 = vpop.eup %665  ;;  %v650_v58 = vmul.f32 -1.442695, %v272_v54 }
  0x99   :  { %v303_v57 = vadd.f32 1.0, %v666_v56 }
  0x9a   :  { %165 = vadd.xlane.f32.xlu0 %v164_v55  ;;  %v273_v55 = vadd.f32 %v955_v42, %v961_v45 }
  0x9b   :  { %667 = vrcp.f32 %v303_v57  ;;  %v322_v1 = vand.u32 2147483648, %v303_v57  ;;  %vm316_vm6 = vweird.f32 %v303_v57  ;;  %v320_v31 = vand.u32 2147483647, %v303_v57 }
  0x9c   :  { %v974_v59 = vpop.xlane.xlu1 %99  ;;  %v178_v60 = vpop.xlane.xlu2 %177  ;;  %669 = vpow2.f32 %v650_v58 }
  0x9d   :  { %v976_v61 = vpop.xlane.xlu0 %96  ;;  %v482_v14 = vperm.slane %v178_v60, %v978_v63  ;;  %v323_v38 = vor.u32 1.1754944e-38, %v322_v1  ;;  %vm321_vm10 = vcmp.eq.f32.partialorder %v320_v31, 8.507059e+37 }
  0xa1   :  { %v668_v62 = vpop.eup %667 }
  0xa2   :  { %v312_v3 = vmul.f32 %v668_v62, %v303_v57  ;;  %v670_v5 = vpop.eup %669  ;;  %vm317_vm4 = vweird.f32 %v668_v62 }
  0xa3   :  { %v304_v10 = vadd.f32 1.0, %v670_v5  ;;  %vm989_vm7 = vmor %vm316_vm6, %vm317_vm4  ;;  %vm505_vm4 = vcmask 64512  }
  0xa4   :  { %v184_v6 = vpop.xlane.xlu1 %183  ;;  %v187_v7 = vpop.xlane.xlu2 %186  ;;  %v313_v12 = vsub.f32 1.0, %v312_v3  ;;  %v138_v3 = vmul.f32 %v924_v24, %v845_v9  ;;  %v141_v9 = vmul.f32 %v924_v24, %v861_v22 }
  0xa5   :  { %v181_v11 = vpop.xlane.xlu0 %180  ;;  %671 = vrcp.f32 %v304_v10  ;;  %v484_v16 = vperm.slane %v184_v6, %v978_v63  ;;  %v485_v19 = vperm.slane %v187_v7, %v978_v63  ;;  %v337_v36 = vand.u32 2147483648, %v304_v10 }
  0xa6   :  { %v483_v15 = vperm.slane %v181_v11, %v978_v63  ;;  %v314_v17 = vmul.f32 %v668_v62, %v313_v12  ;;  %v335_v13 = vand.u32 2147483647, %v304_v10  ;;  %vm331_vm12 = vweird.f32 %v304_v10 }
  0xa7   :  { %v338_v48 = vor.u32 1.1754944e-38, %v337_v36  ;;  %v152_v45 = vsel %vm76_vm0, %v138_v3, 0.0 }
  0xa8   :  { %v491_v18 = vsel %vm490_vm1, %v483_v15, %v482_v14  ;;  %v315_v28 = vadd.f32 %v668_v62, %v314_v17  ;;  %vm336_vm15 = vcmp.eq.f32.partialorder %v335_v13, 8.507059e+37 }
  0xa9   :  { %v493_v26 = vsel %vm492_vm2, %v484_v16, %v491_v18 }
  0xaa   :  { %v495_v32 = vsel %vm494_vm3, %v485_v19, %v493_v26  ;;  %v319_v37 = vsel %vm989_vm7, %v668_v62, %v315_v28  ;;  %v651_v62 = vmul.f32 -1.442695, %v273_v55 }
  0xab   :  { %v672_v25 = vpop.eup %671  ;;  %v997_v46 = vsel %vm321_vm10, %v323_v38, %v319_v37 }
  0xac   :  { %v193_v20 = vpop.xlane.xlu1 %192  ;;  %v196_v23 = vpop.xlane.xlu2 %195  ;;  %v327_v30 = vmul.f32 %v672_v25, %v304_v10  ;;  %vm332_vm9 = vweird.f32 %v672_v25  ;;  %673 = vpow2.f32 %v651_v62  ;;  %v107_v10 = vmul.f32 %v881_v40, %v843_v8 }
  0xad   :  { %v190_v27 = vpop.xlane.xlu0 %189  ;;  %v487_v4 = vperm.slane %v193_v20, %v978_v63  ;;  %v488_v39 = vperm.slane %v196_v23, %v978_v63  ;;  %vm333_vm13 = vmor %vm331_vm12, %vm332_vm9  ;;  %v161_v23 = vsel %vm76_vm0, %v141_v9, 0.0 }
  0xae   :  { %v486_v29 = vperm.slane %v190_v27, %v978_v63  ;;  %v328_v33 = vsub.f32 1.0, %v327_v30  ;;  %v125_v16 = vsel %vm76_vm0, %v107_v10, 0.0 }
  0xb0   :  { %v497_v35 = vsel %vm496_vm5, %v486_v29, %v495_v32  ;;  %v329_v2 = vmul.f32 %v672_v25, %v328_v33 }
  0xb1   :  { %v499_v47 = vsel %vm498_vm8, %v487_v4, %v497_v35 }
  0xb2   :  { %v330_v43 = vadd.f32 %v672_v25, %v329_v2  ;;  %v501_v57 = vsel %vm500_vm11, %v488_v39, %v499_v47  ;;  %v674_v14 = vpop.eup %673 }
  0xb3   :  { %v1020_v17 = vadd.f32 1.0, %v674_v14 }
  0xb4   :  { %v115_v41 = vpop.xlane.xlu2 %114  ;;  %v112_v0 = vpop.xlane.xlu1 %111  ;;  %v334_v53 = vsel %vm333_vm13, %v672_v25, %v330_v43 }
  0xb5   :  { %v1001_v49 = vmul.f32 %v997_v46, %v112_v0  ;;  %v199_v50 = vpop.xlane.xlu0 %198  ;;  %v1006_v56 = vsel %vm336_vm15, %v338_v48, %v334_v53  ;;  %675 = vrcp.f32 %v1020_v17  ;;  %vm346_vm0 = vweird.f32 %v1020_v17 }
  0xb6   :  { %v489_v54 = vperm.slane %v199_v50, %v978_v63  ;;  %v1010_v58 = vmul.f32 %v1006_v56, %v115_v41  ;;  %v352_v3 = vand.u32 2147483648, %v1020_v17 }
  0xb8   :  { %v503_v60 = vsel %vm502_vm14, %v489_v54, %v501_v57 }
  0xb9   :  { %v506_v21 = vsel %vm505_vm4, %v503_v60, 0.0 }
  0xba   :  { %507 = vadd.xlane.f32.xlu1 %v506_v21 }
  0xbb   :  { %v676_v8 = vpop.eup %675 }
  0xbc   :  { %v244_v5 = vpop.xlane.xlu2 %243  ;;  %v214_v6 = vpop.xlane.xlu1 %213  ;;  %v342_v28 = vmul.f32 %v676_v8, %v1020_v17  ;;  %vm347_vm6 = vweird.f32 %v676_v8 }
  0xbd   :  { %v211_v7 = vpop.xlane.xlu0 %210  ;;  %v526_v25 = vperm.slane %v214_v6, %v978_v63  ;;  %v553_v31 = vperm.slane %v244_v5, %v978_v63  ;;  %vm348_vm7 = vmor %vm346_vm0, %vm347_vm6 }
  0xbe   :  { %v525_v26 = vperm.slane %v211_v7, %v978_v63  ;;  %v343_v1 = vsub.f32 1.0, %v342_v28  ;;  %v439_v7 = vsub.f32 1.0, %v997_v46 }
  0xc0   :  { %v533_v30 = vsel %vm490_vm1, %v526_v25, %v525_v26  ;;  %v344_v38 = vmul.f32 %v676_v8, %v343_v1  ;;  %v440_v25 = vsub.f32 1.0, %v1006_v56  ;;  %v1067_v26 = vstv %s648_s2 }
  0xc2   :  { %153 = vadd.xlane.f32.xlu1 %v152_v45  ;;  %v345_v57 = vadd.f32 %v676_v8, %v344_v38  ;;  %v350_v45 = vand.u32 2147483647, %v1020_v17 }
  0xc4   :  { %v250_v11 = vpop.xlane.xlu2 %249  ;;  %v217_v12 = vpop.xlane.xlu1 %216  ;;  %vm351_vm9 = vcmp.eq.f32.partialorder %v350_v45, 8.507059e+37 }
  0xc5   :  { %v247_v15 = vpop.xlane.xlu0 %246  ;;  %v527_v29 = vperm.slane %v217_v12, %v978_v63  ;;  %v555_v37 = vperm.slane %v250_v11, %v978_v63  ;;  %v349_v12 = vsel %vm348_vm7, %v676_v8, %v345_v57 }
  0xc6   :  { %v554_v32 = vperm.slane %v247_v15, %v978_v63  ;;  %v353_v15 = vor.u32 1.1754944e-38, %v352_v3 }
  0xc7   :  { %v534_v4 = vsel %vm492_vm2, %v527_v29, %v533_v30 }
  0xc8   :  { %v561_v39 = vsel %vm490_vm1, %v554_v32, %v553_v31 }
  0xc9   :  { %v562_v54 = vsel %vm492_vm2, %v555_v37, %v561_v39  ;;  %v278_v39 = vadd.f32 %v955_v42, %v974_v59 }
  0xca   :  { %126 = vadd.xlane.f32.xlu1 %v125_v16 }
  0xcc   :  { %v223_v18 = vpop.xlane.xlu2 %222  ;;  %v253_v19 = vpop.xlane.xlu1 %252 }
  0xcd   :  { %v220_v20 = vpop.xlane.xlu0 %219  ;;  %v529_v33 = vperm.slane %v223_v18, %v978_v63  ;;  %v556_v41 = vperm.slane %v253_v19, %v978_v63  ;;  %v354_v19 = vsel %vm351_vm9, %v353_v15, %v349_v12 }
  0xce   :  { %v528_v24 = vperm.slane %v220_v20, %v978_v63 }
  0xcf   :  { %v563_v60 = vsel %vm494_vm3, %v556_v41, %v562_v54 }
  0xd0   :  { %v535_v34 = vsel %vm494_vm3, %v528_v24, %v534_v4 }
  0xd1   :  { %v536_v43 = vsel %vm496_vm5, %v529_v33, %v535_v34 }
  0xd2   :  { %162 = vadd.xlane.f32.xlu1 %v161_v23 }
  0xd4   :  { %v259_v40 = vpop.xlane.xlu2 %258  ;;  %v226_v22 = vpop.xlane.xlu1 %225 }
  0xd5   :  { %v256_v27 = vpop.xlane.xlu0 %255  ;;  %v530_v35 = vperm.slane %v226_v22, %v978_v63  ;;  %v558_v21 = vperm.slane %v259_v40, %v978_v63  ;;  %v441_v40 = vsub.f32 1.0, %v354_v19 }
  0xd6   :  { %v557_v48 = vperm.slane %v256_v27, %v978_v63 }
  0xd7   :  { %v537_v47 = vsel %vm498_vm8, %v530_v35, %v536_v43  ;;  %v275_v35 = vadd.f32 %v955_v42, %v959_v44  ;;  %v277_v44 = vadd.f32 %v955_v42, %v976_v61 }
  0xd8   :  { %v564_v5 = vsel %vm496_vm5, %v557_v48, %v563_v60 }
  0xd9   :  { %v565_v9 = vsel %vm498_vm8, %v558_v21, %v564_v5 }
  0xdc   :  { %v232_v36 = vpop.xlane.xlu2 %231  ;;  %v262_v50 = vpop.xlane.xlu1 %261 }
  0xdd   :  { %v532_v2 = vperm.slane %v232_v36, %v978_v63  ;;  %v229_v13 = vpop.xlane.xlu0 %228  ;;  %v559_v6 = vperm.slane %v262_v50, %v978_v63  ;;  %v653_v36 = vmul.f32 -1.442695, %v275_v35 }
  0xde   :  { %v531_v0 = vperm.slane %v229_v13, %v978_v63 }
  0xdf   :  { %v566_v46 = vsel %vm500_vm11, %v559_v6, %v565_v9  ;;  %677 = vpow2.f32 %v653_v36 }
  0xe0   :  { %v538_v53 = vsel %vm500_vm11, %v531_v0, %v537_v47  ;;  %v656_v0 = vmul.f32 -1.442695, %v278_v39  ;;  %v800_v47 = vmov 8.0  }
  0xe1   :  { %v539_v55 = vsel %vm502_vm14, %v532_v2, %v538_v53  ;;  %v276_v2 = vadd.f32 %v955_v42, %v968_v51  ;;  %v655_v51 = vmul.f32 -1.442695, %v277_v44 }
  0xe2   :  { %v541_v62 = vsel %vm505_vm4, %v539_v55, 0.0 }
  0xe3   :  { %542 = vadd.xlane.f32.xlu1 %v541_v62  ;;  %v654_v38 = vmul.f32 -1.442695, %v276_v2 }
  0xe4   :  { %v145_v10 = vpop.xlane.xlu2 %144  ;;  %v118_v23 = vpop.xlane.xlu1 %117 }
  0xe5   :  { %v447_v11 = vmul.f32 %v439_v7, %v145_v10  ;;  %v265_v14 = vpop.xlane.xlu0 %264  ;;  %v433_v27 = vmul.f32 %v354_v19, %v118_v23  ;;  %v678_v13 = vpop.eup %677 }
  0xe6   :  { %v560_v16 = vperm.slane %v265_v14, %v978_v63  ;;  %v307_v41 = vadd.f32 1.0, %v678_v13 }
  0xe7   :  { %v455_v18 = vadd.f32 %v447_v11, %v1001_v49 }
  0xe8   :  { %v567_v20 = vsel %vm502_vm14, %v560_v16, %v566_v46  ;;  %v382_v16 = vand.u32 2147483648, %v307_v41 }
  0xe9   :  { %v569_v17 = vsel %vm505_vm4, %v567_v20, 0.0  ;;  %v464_v24 = vadd.f32 %v1067_v26, %v455_v18  ;;  %v380_v18 = vand.u32 2147483647, %v307_v41 }
  0xea   :  { %570 = vadd.xlane.f32.xlu2 %v569_v17  ;;  %v383_v23 = vor.u32 1.1754944e-38, %v382_v16 }
  0xeb   :  { %v608_v32 = vperm.slane %v464_v24, %v978_v63  ;;  %vm381_vm0 = vcmp.eq.f32.partialorder %v380_v18, 8.507059e+37 }
  0xec   :  { %v151_v8 = vpop.xlane.xlu2 %150 }
  0xed   :  { %v449_v28 = vmul.f32 %v441_v40, %v151_v8  ;;  %v148_v29 = vpop.xlane.xlu0 %147 }
  0xee   :  { %v448_v49 = vmul.f32 %v440_v25, %v148_v29 }
  0xef   :  { %v457_v22 = vadd.f32 %v449_v28, %v433_v27 }
  0xf0   :  { %v456_v30 = vadd.f32 %v448_v49, %v1010_v58  ;;  %v274_v58 = vadd.f32 %v955_v42, %v970_v52 }
  0xf1   :  { %v466_v1 = vadd.f32 %v1067_v26, %v457_v22 }
  0xf2   :  { %v465_v31 = vadd.f32 %v1067_v26, %v456_v30  ;;  %v652_v37 = vmul.f32 -1.442695, %v274_v58 }
  0xf3   :  { %v610_v4 = vperm.slane %v466_v1, %v978_v63  ;;  %v573_v1 = vstv %s1109_s27 }
  0xf4   :  { %v609_v56 = vperm.slane %v465_v31, %v978_v63  ;;  %679 = vpow2.f32 %v652_v37  ;;  %v124_v49 = vpop.xlane.xlu2 %123 }
  0xf5   :  { %681 = vpow2.f32 %v654_v38  ;;  %v1100_v5 = vpop.xlane.xlu0 %120 }
  0xf6   :  { %v616_v33 = vsel %vm490_vm1, %v609_v56, %v608_v32  ;;  %683 = vrcp.f32 %v307_v41  ;;  %vm376_vm1 = vweird.f32 %v307_v41 }
  0xf7   :  { %v1078_v34 = vsel %vm492_vm2, %v610_v4, %v616_v33  ;;  %685 = vrcp.f32 %v800_v47 }
  0xf8   :  { %687 = vpow2.f32 %v656_v0 }
  0xfa   :  { %v680_v43 = vpop.eup %679 }
  0xfb   :  { %v1090_v52 = vadd.f32 1.0, %v680_v43  ;;  %v682_v48 = vpop.eup %681 }
  0xfc   :  { %v684_v50 = vpop.eup %683  ;;  %v1093_v59 = vadd.f32 1.0, %v682_v48 }
  0xfd   :  { %689 = vrcp.f32 %v1090_v52  ;;  %v686_v53 = vpop.eup %685  ;;  %v372_v55 = vmul.f32 %v684_v50, %v307_v41  ;;  %vm377_vm2 = vweird.f32 %v684_v50  ;;  %vm361_vm13 = vweird.f32 %v1090_v52  ;;  %v157_v8 = vpop.xlane.xlu0 %156 }
  0xfe   :  { %691 = vpow2.f32 %v655_v51  ;;  %v688_v54 = vpop.eup %687  ;;  %v510_v60 = vmul.f32 8.0, %v686_v53  ;;  %vm378_vm10 = vmor %vm376_vm1, %vm377_vm2  ;;  %vm514_vm12 = vweird.f32 %v686_v53  ;;  %v367_v27 = vand.u32 2147483648, %v1090_v52 }
  0xff   :  { %693 = vrcp.f32 %v1093_v59  ;;  %v1096_v42 = vadd.f32 1.0, %v688_v54  ;;  %v373_v61 = vsub.f32 1.0, %v372_v55  ;;  %v365_v22 = vand.u32 2147483647, %v1090_v52  ;;  %v160_v55 = vpop.xlane.xlu2 %159 }
 0x100   :  { %v511_v3 = vsub.f32 1.0, %v510_v60  ;;  %v368_v33 = vor.u32 1.1754944e-38, %v367_v27  ;;  %vm391_vm9 = vweird.f32 %v1093_v59  ;;  %v397_v43 = vand.u32 2147483648, %v1093_v59 }
 0x101   :  { %695 = vrcp.f32 %v1096_v42  ;;  %v374_v7 = vmul.f32 %v684_v50, %v373_v61  ;;  %vm366_vm7 = vcmp.eq.f32.partialorder %v365_v22, 8.507059e+37  ;;  %v395_v44 = vand.u32 2147483647, %v1093_v59 }
 0x102   :  { %v512_v11 = vmul.f32 %v686_v53, %v511_v3  ;;  %v398_v61 = vor.u32 1.1754944e-38, %v397_v43 }
 0x103   :  { %v690_v57 = vpop.eup %689  ;;  %v375_v12 = vadd.f32 %v684_v50, %v374_v7 }
 0x104   :  { %v692_v21 = vpop.eup %691  ;;  %v357_v62 = vmul.f32 %v690_v57, %v1090_v52  ;;  %v513_v46 = vadd.f32 %v686_v53, %v512_v11  ;;  %vm362_vm15 = vweird.f32 %v690_v57 }
 0x105   :  { %v1102_v6 = vadd.f32 1.0, %v692_v21  ;;  %v1104_v45 = vpop.eup %693  ;;  %v379_v19 = vsel %vm378_vm10, %v684_v50, %v375_v12  ;;  %vm363_vm6 = vmor %vm361_vm13, %vm362_vm15  ;;  %vm421_vm10 = vweird.f32 %v1096_v42  ;;  %v130_v52 = vpop.xlane.xlu0 %129  ;;  %v425_v21 = vand.u32 2147483647, %v1096_v42 }
 0x106   :  { %v358_v10 = vsub.f32 1.0, %v357_v62  ;;  %v387_v14 = vmul.f32 %v1104_v45, %v1093_v59  ;;  %v1119_v28 = vsel %vm514_vm12, %v686_v53, %v513_v46  ;;  %v384_v29 = vsel %vm381_vm0, %v383_v23, %v379_v19 }
 0x107   :  { %697 = vrcp.f32 %v1102_v6  ;;  %v1111_v15 = vpop.eup %695  ;;  %v443_v35 = vsub.f32 1.0, %v384_v29  ;;  %vm392_vm1 = vweird.f32 %v1104_v45  ;;  %v435_v41 = vmul.f32 %v384_v29, %v124_v49 }
 0x108   :  { %v359_v9 = vmul.f32 %v690_v57, %v358_v10  ;;  %v388_v20 = vsub.f32 1.0, %v387_v14  ;;  %v417_v17 = vmul.f32 %v1111_v15, %v1096_v42  ;;  %vm1132_vm2 = vmor %vm391_vm9, %vm392_vm1  ;;  %vm422_vm12 = vweird.f32 %v1111_v15 }
 0x109   :  { %v451_v2 = vmul.f32 %v443_v35, %v157_v8  ;;  %v427_v59 = vand.u32 2147483648, %v1096_v42  ;;  %vm396_vm13 = vcmp.eq.f32.partialorder %v395_v44, 8.507059e+37  ;;  %vm1149_vm15 = vmor %vm421_vm10, %vm422_vm12  ;;  %v412_v14 = vand.u32 2147483648, %v1102_v6 }
 0x10a   :  { %v360_v40 = vadd.f32 %v690_v57, %v359_v9  ;;  %v389_v24 = vmul.f32 %v1104_v45, %v388_v20  ;;  %v418_v30 = vsub.f32 1.0, %v417_v17  ;;  %v410_v46 = vand.u32 2147483647, %v1102_v6 }
 0x10b   :  { %v459_v48 = vadd.f32 %v451_v2, %v435_v41  ;;  %v428_v11 = vor.u32 1.1754944e-38, %v427_v59  ;;  %v413_v29 = vor.u32 1.1754944e-38, %v412_v14 }
 0x10c   :  { %v364_v4 = vsel %vm363_vm6, %v690_v57, %v360_v40  ;;  %v390_v37 = vadd.f32 %v1104_v45, %v389_v24  ;;  %v419_v13 = vmul.f32 %v1111_v15, %v418_v30  ;;  %vm426_vm6 = vcmp.eq.f32.partialorder %v425_v21, 8.507059e+37 }
 0x10d   :  { %v1116_v25 = vpop.eup %697  ;;  %v369_v58 = vsel %vm366_vm7, %v368_v33, %v364_v4  ;;  %vm406_vm7 = vweird.f32 %v1102_v6  ;;  %v166_v40 = vpop.xlane.xlu0 %165  ;;  %vm411_vm1 = vcmp.eq.f32.partialorder %v410_v46, 8.507059e+37  ;;  %v598_v21 = vstv %s646_s28 }
 0x10e   :  { %v402_v32 = vmul.f32 %v1116_v25, %v1102_v6  ;;  %v442_v47 = vsub.f32 1.0, %v369_v58  ;;  %v394_v51 = vsel %vm1132_vm2, %v1104_v45, %v390_v37  ;;  %v420_v50 = vadd.f32 %v1111_v15, %v419_v13  ;;  %v133_v6 = vpop.xlane.xlu2 %132 }
 0x10f   :  { %v434_v54 = vmul.f32 %v369_v58, %v1100_v5  ;;  %v399_v7 = vsel %vm396_vm13, %v398_v61, %v394_v51  ;;  %v468_v5 = vadd.f32 %v1067_v26, %v459_v48  ;;  %vm407_vm0 = vweird.f32 %v1116_v25 }
 0x110   :  { %v403_v38 = vsub.f32 1.0, %v402_v32  ;;  %v424_v45 = vsel %vm1149_vm15, %v1111_v15, %v420_v50  ;;  %v444_v9 = vsub.f32 1.0, %v399_v7  ;;  %vm408_vm9 = vmor %vm406_vm7, %vm407_vm0 }
 0x111   :  { %v429_v18 = vsel %vm426_vm6, %v428_v11, %v424_v45  ;;  %v612_v19 = vperm.slane %v468_v5, %v978_v63 }
 0x112   :  { %v404_v57 = vmul.f32 %v1116_v25, %v403_v38  ;;  %v452_v17 = vmul.f32 %v444_v9, %v160_v55  ;;  %v446_v49 = vsub.f32 1.0, %v429_v18  ;;  %v438_v4 = vmul.f32 %v429_v18, %v133_v6 }
 0x114   :  { %v405_v12 = vadd.f32 %v1116_v25, %v404_v57 }
 0x116   :  { %v409_v23 = vsel %vm408_vm9, %v1116_v25, %v405_v12 }
 0x117   :  { %v414_v30 = vsel %vm411_vm1, %v413_v29, %v409_v23 }
 0x118   :  { %v445_v32 = vsub.f32 1.0, %v414_v30  ;;  %v437_v35 = vmul.f32 %v414_v30, %v130_v52 }
 0x12d   :  { %v508_v31 = vpop.xlane.xlu1 %507 }
 0x12e   :  { %v516_v56 = vmul.f32 %v1119_v28, %v508_v31 }
 0x130   :  { %v574_v36 = vadd.f32 %v573_v1, %v516_v56  ;;  %v454_v1 = vmul.f32 %v446_v49, %v166_v40 }
 0x132   :  { %v657_v39 = vmul.f32 -1.442695, %v574_v36  ;;  %v462_v33 = vadd.f32 %v454_v1, %v438_v4 }
 0x134   :  { %699 = vpow2.f32 %v657_v39  ;;  %v471_v13 = vadd.f32 %v1067_v26, %v462_v33 }
 0x135   :  { %v154_v53 = vpop.xlane.xlu1 %153 }
 0x136   :  { %v450_v60 = vmul.f32 %v442_v47, %v154_v53  ;;  %v615_v43 = vperm.slane %v471_v13, %v978_v63 }
 0x138   :  { %v458_v3 = vadd.f32 %v450_v60, %v434_v54 }
 0x13a   :  { %v700_v10 = vpop.eup %699  ;;  %v467_v42 = vadd.f32 %v1067_v26, %v458_v3 }
 0x13b   :  { %v578_v16 = vadd.f32 1.0, %v700_v10 }
 0x13c   :  { %v611_v15 = vperm.slane %v467_v42, %v978_v63 }
 0x13d   :  { %v127_v20 = vpop.xlane.xlu1 %126  ;;  %701 = vrcp.f32 %v578_v16  ;;  %v590_v51 = vand.u32 2147483648, %v578_v16  ;;  %v588_v48 = vand.u32 2147483647, %v578_v16 }
 0x13e   :  { %v618_v8 = vsel %vm494_vm3, %v611_v15, %v1078_v34  ;;  %v436_v27 = vmul.f32 %v399_v7, %v127_v20 }
 0x13f   :  { %v619_v22 = vsel %vm496_vm5, %v612_v19, %v618_v8  ;;  %vm584_vm5 = vweird.f32 %v578_v16  ;;  %vm589_vm2 = vcmp.eq.f32.partialorder %v588_v48, 8.507059e+37 }
 0x140   :  { %v460_v24 = vadd.f32 %v452_v17, %v436_v27 }
 0x142   :  { %v469_v31 = vadd.f32 %v1067_v26, %v460_v24 }
 0x143   :  { %v702_v56 = vpop.eup %701 }
 0x144   :  { %v613_v25 = vperm.slane %v469_v31, %v978_v63  ;;  %v580_v2 = vmul.f32 %v702_v56, %v578_v16  ;;  %vm585_vm3 = vweird.f32 %v702_v56 }
 0x145   :  { %v163_v34 = vpop.xlane.xlu1 %162 }
 0x146   :  { %v453_v36 = vmul.f32 %v445_v32, %v163_v34  ;;  %v620_v58 = vsel %vm498_vm8, %v613_v25, %v619_v22  ;;  %v581_v41 = vsub.f32 1.0, %v580_v2  ;;  %vm586_vm8 = vmor %vm584_vm5, %vm585_vm3 }
 0x148   :  { %v461_v37 = vadd.f32 %v453_v36, %v437_v35  ;;  %v582_v47 = vmul.f32 %v702_v56, %v581_v41 }
 0x14a   :  { %v470_v38 = vadd.f32 %v1067_v26, %v461_v37  ;;  %v583_v52 = vadd.f32 %v702_v56, %v582_v47  ;;  %v591_v26 = vor.u32 1.1754944e-38, %v590_v51 }
 0x14c   :  { %v614_v39 = vperm.slane %v470_v38, %v978_v63  ;;  %v587_v50 = vsel %vm586_vm8, %v702_v56, %v583_v52 }
 0x14d   :  { %v592_v54 = vsel %vm589_vm2, %v591_v26, %v587_v50 }
 0x14e   :  { %v621_v0 = vsel %vm500_vm11, %v614_v39, %v620_v58  ;;  %v595_v59 = vsub.f32 1.0, %v592_v54  ;;  %vm625_vm11 = vcmask 72768  }
 0x14f   :  { %v622_v44 = vsel %vm502_vm14, %v615_v43, %v621_v0 }
 0x150   :  { %624 = vst.msk [vmem:[#allocation9] sm:$0xff] %vm505_vm4, %v622_v44 }
 0x156   :  { %v543_v53 = vpop.xlane.xlu1 %542 }
 0x157   :  { %v544_v63 = vmul.f32 %v543_v53, %v1119_v28 }
 0x159   :  { %v594_v60 = vmul.f32 %v592_v54, %v544_v63 }
 0x15d   :  { %v571_v55 = vpop.xlane.xlu2 %570 }
 0x15e   :  { %v572_v57 = vmul.f32 %v571_v55, %v1119_v28 }
 0x160   :  { %v596_v61 = vmul.f32 %v595_v59, %v572_v57 }
 0x162   :  { %v597_v62 = vadd.f32 %v596_v61, %v594_v60 }
 0x164   :  { %v599_v3 = vadd.f32 %v598_v21, %v597_v62 }
 0x166   :  { %626 = vst.msk [vmem:[#allocation9] sm:$0xff] %vm625_vm11, %v599_v3 }
 0x167   :  { %637 = dma.vmem_to_hbm [thread:$0]  %s633_s30, 128, %s635_s6, [#allocation4]  }
 0x168   :  { %793 = dma.done.wait [#allocation4], 128  }
 0x169   :  { %794 = vsyncadd [#allocation4], 4294967168 }
 0x16a   :  { %642 = vsyncpa [#allocation3], 1 }
 0x16b   :  { %643 = vsyncpa [#allocation7], 1 }
 0x16c   :  { %644 = vsyncpa [#allocation4], 1 }
 0x16d   :  { %645 = vsyncpa [#allocation5], 1 }

</bundles_post_ra>
